<compile_context>
chip_gen: v6e
topology: v6e:2x2x1
jax: 0.10.0
libtpu: 0.0.40
codegen_flags: <defaults>
</compile_context>

<pallas_src>
import math
import functools

import jax
import jax.numpy as jnp
from jax import lax
from jax.experimental import pallas as pl
from jax.experimental.pallas import tpu as pltpu


# ----------------------------------------------------------------------------- kernel

def _attn_norm_kernel(*refs, scale_mul, g_sa, omiga, bias, diag_mask,
                      method, inv_log_train_len, use_mask, tq_full):
    if use_mask:
        scores_ref, mask_ref, out_ref = refs
    else:
        scores_ref, out_ref = refs
        mask_ref = None

    s = scores_ref[...].astype(jnp.float32)           # (Hblk, TQ_TILE, Tk)
    tq, tk = s.shape[-2], s.shape[-1]
    q0 = pl.program_id(1) * tq                        # global q-row offset of this tile

    # --- optional g_sa relative-distance bias (static python branch) ---
    if g_sa:
        # PyTorch: q_pos = arange(Tk - Tq, Tk), k_pos = arange(Tk); dis = (k - q)^2
        q_idx = lax.broadcasted_iota(jnp.int32, (tq, tk), 0) + (q0 + (tk - tq_full))
        k_idx = lax.broadcasted_iota(jnp.int32, (tq, tk), 1)
        d = (k_idx - q_idx).astype(jnp.float32)
        dis = -jnp.abs(jnp.abs(d * d * jnp.float32(omiga)) - jnp.float32(abs(bias)))
        s = s + dis                                   # (tq,tk) broadcasts over heads

    # --- scaling (scale_adapt and plain 1/sqrt(d_k) both fold to one static multiply) ---
    s = s * jnp.float32(scale_mul)

    # --- masking: a single boolean `keep` (tq,tk), broadcast over the head axis ---
    keep = None
    if use_mask:
        keep = mask_ref[...] != 0
        if diag_mask:
            row = lax.broadcasted_iota(jnp.int32, (tq, tk), 0) + q0
            col = lax.broadcasted_iota(jnp.int32, (tq, tk), 1)
            keep = keep & (row != col)
        s = jnp.where(keep, s, jnp.float32(-10000.0))

    # --- attention_normalize (dim=-1) ---
    if method == "softmax":
        mx = jnp.max(s, axis=-1, keepdims=True)
        e = jnp.exp(s - mx)
        attn = e / jnp.sum(e, axis=-1, keepdims=True)
    else:
        # Matches PyTorch: valid-key indicator derived from the (masked-filled) scores.
        valid = (s > -10000.0).astype(jnp.float32)
        l = jnp.maximum(jnp.sum(valid, axis=-1, keepdims=True), 1.0)
        if method == "relu_plus":
            r = jnp.maximum(s, 0.0)
            attn = (r * r) / l
        elif method == "softmax_plus":
            sc = (jnp.log(l) * jnp.float32(inv_log_train_len)) * valid + (1.0 - valid)
            ss = s * sc
            mx = jnp.max(ss, axis=-1, keepdims=True)
            e = jnp.exp(ss - mx)
            attn = e / jnp.sum(e, axis=-1, keepdims=True)
        else:
            raise ValueError("check your attention norm")

    # Final masked zero-fill; reuses the same boolean (no extra f32 mask copy kept live).
    if use_mask:
        attn = jnp.where(keep, attn, jnp.float32(0.0))

    out_ref[...] = attn.astype(out_ref.dtype)


# ----------------------------------------------------------------------------- sizing helpers

def _sublane_quantum(dtype):
    # Packed-sublane layout: (8,128) for 4-byte, (16,128) for 2-byte, (32,128) for 1-byte.
    return max(8, 32 // jnp.dtype(dtype).itemsize)


def _vmem_budgets():
    """(vmem_limit_bytes, block_budget_bytes) derived from the actual chip generation."""
    cap = 0
    try:
        info = pltpu.get_tpu_info()
        cap = int(getattr(info, "vmem_capacity_bytes", 0) or 0)
    except Exception:
        cap = 0
    if cap <= 0:
        cap = 64 * 1024 * 1024                 # conservative fallback: v7x per-TC VMEM
    vmem_limit = min(int(cap * 0.85), 112 * 1024 * 1024)   # ~108 MiB on 128 MiB chips, ~54 MiB on v7x
    block_budget = int(vmem_limit * 0.60)                  # per-block budget used by the chooser
    return vmem_limit, block_budget


def _per_row_bytes(heads, Tk, bytes_io, use_mask):
    """VMEM cost per q-row of one block: double-buffered I/O + live f32 intermediates."""
    io = 2 * (2 * heads * Tk * bytes_io + (Tk if use_mask else 0))   # scores in+out, int8 mask
    scratch = 3 * heads * Tk * 4                                     # ~3 f32 copies (s, e, attn)
    return io + scratch


def _choose_heads_per_block(H, Tq, Tk, bytes_io, use_mask, quantum, budget):
    """Largest divisor of H such that a minimal-row block still fits the budget."""
    min_rows = min(Tq, quantum)
    for hs in range(H, 0, -1):
        if H % hs:
            continue
        if min_rows * _per_row_bytes(hs, Tk, bytes_io, use_mask) <= budget:
            return hs
    return 1


def _choose_tq_tile(Tq, heads, Tk, bytes_io, use_mask, quantum, budget):
    """Largest q-tile (multiple of the dtype sublane quantum, or full Tq) fitting the budget."""
    per_row = _per_row_bytes(heads, Tk, bytes_io, use_mask)
    max_rows = budget // max(per_row, 1)
    if Tq <= max_rows:
        return Tq                                    # whole Tq in one block
    max_rows = max(quantum, (max_rows // quantum) * quantum)
    tile = min(max_rows, Tq)
    t = (tile // quantum) * quantum
    while t >= quantum:                              # prefer a divisor of Tq (no ragged block)
        if Tq % t == 0:
            return t
        t -= quantum
    return max(tile, quantum)                        # ragged last block; OOB rows are discarded


# ----------------------------------------------------------------------------- wrapper

def attention_normalize(scores, mask=None, *, d_k, att_type="mlh", scale_adapt=False,
                        norm_method="softmax", diag_mask=False, g_sa=False,
                        train_len=512, vmem_block_budget=None):
    """JAX/Pallas equivalent of AttentionNormalize.forward (dim=-1, att_type='mlh').

    scores: (B, H, Tq, Tk), any float dtype (streamed through HBM at native width)
    mask:   (B, Tq, Tk) with nonzero = keep, or None / zero-size for "no mask"
    """
    assert norm_method in ("softmax", "relu_plus", "softmax_plus")
    if g_sa and "softmax" not in norm_method:
        raise ValueError("g_sa just support softmax form calculate now")
    # TODO(synk): att_type='gau' uses a 3-D score/mask layout (no head broadcast);
    # only the 'mlh' (B, H, Tq, Tk) path is implemented here.
    B, H, Tq, Tk = scores.shape
    use_mask = mask is not None and mask.shape[-1] > 0

    # Untrained-parameter values exactly as in __init__ (scale / omiga / bias / train_len
    # are nn.Parameters in PyTorch; folded here as their init-time constants).
    if scale_adapt:
        scale_mul = math.exp(math.log(d_k ** (-0.5)))   # == d_k ** -0.5
    else:
        scale_mul = 1.0 / math.sqrt(d_k)
    omiga = 0.001
    bias = -0.001
    inv_log_train_len = 1.0 / math.log(train_len)

    bytes_io = jnp.dtype(scores.dtype).itemsize
    quantum = _sublane_quantum(scores.dtype)

    vmem_limit, auto_budget = _vmem_budgets()
    block_budget = vmem_block_budget if vmem_block_budget is not None else auto_budget

    heads_per_block = _choose_heads_per_block(H, Tq, Tk, bytes_io, use_mask, quantum, block_budget)
    tq_tile = _choose_tq_tile(Tq, heads_per_block, Tk, bytes_io, use_mask, quantum, block_budget)
    num_q = pl.cdiv(Tq, tq_tile)
    n_groups = H // heads_per_block

    kernel = functools.partial(
        _attn_norm_kernel,
        scale_mul=scale_mul, g_sa=g_sa, omiga=omiga, bias=bias,
        diag_mask=diag_mask, method=norm_method,
        inv_log_train_len=inv_log_train_len, use_mask=use_mask, tq_full=Tq)

    if n_groups == 1:
        grid = (B, num_q)
        scores_spec = pl.BlockSpec((None, H, tq_tile, Tk), lambda b, q: (b, 0, q, 0))
        mask_spec = pl.BlockSpec((None, tq_tile, Tk), lambda b, q: (b, q, 0))
        dims = ("parallel", "parallel")
    else:
        # Head-group axis innermost so the mask block index is constant across it
        # (the mask tile is not re-DMA'd per head group).  No axis accumulates, so all
        # are "parallel" -> v7x megacore may shard any of them.
        grid = (B, num_q, n_groups)
        scores_spec = pl.BlockSpec((None, heads_per_block, tq_tile, Tk),
                                   lambda b, q, g: (b, g, q, 0))
        mask_spec = pl.BlockSpec((None, tq_tile, Tk), lambda b, q, g: (b, q, 0))
        dims = ("parallel", "parallel", "parallel")
    out_spec = scores_spec

    operands = [scores]
    in_specs = [scores_spec]
    if use_mask:
        # Stream the mask as int8 (4x less HBM/VMEM than f32).  bool/int8 masks are used
        # directly; only other dtypes pay a one-off conversion here.
        m = jnp.asarray(mask)[..., :Tk]
        if m.dtype == jnp.bool_:
            m = m.astype(jnp.int8)
        elif m.dtype != jnp.int8:
            m = (m != 0).astype(jnp.int8)
        operands.append(m)
        in_specs.append(mask_spec)

    return pl.pallas_call(
        kernel,
        out_shape=jax.ShapeDtypeStruct((B, H, Tq, Tk), scores.dtype),
        grid=grid,
        in_specs=in_specs,
        out_specs=out_spec,
        compiler_params=pltpu.CompilerParams(
            dimension_semantics=dims,
            vmem_limit_bytes=vmem_limit),
    )(*operands)


# ----------------------------------------------------------------------------- reference + test

def _ref_norm(a, method, train_len):
    if method == "softmax":
        return jax.nn.softmax(a, axis=-1)
    m = (a > -10000.0).astype(jnp.float32)
    l = jnp.maximum(jnp.sum(m, axis=-1, keepdims=True), 1.0)
    if method == "relu_plus":
        return jnp.maximum(a, 0.0) ** 2 / l
    elif method == "softmax_plus":
        scale = jnp.log(l) / math.log(train_len) * m + 1.0 - m
        return jax.nn.softmax(a * scale, axis=-1)
    raise ValueError("check your attention norm")


def _reference(scores, mask, *, d_k, scale_adapt=False, norm_method="softmax",
               diag_mask=False, g_sa=False, train_len=512):
    s = scores.astype(jnp.float32)
    Tq, Tk = s.shape[-2], s.shape[-1]
    if g_sa:
        q_pos = jnp.arange(Tk - Tq, Tk)
        k_pos = jnp.arange(Tk)
        dis = (k_pos[None, :] - q_pos[:, None]).astype(jnp.float32) ** 2
        dis = -jnp.abs(jnp.abs(dis * 0.001) - 0.001)
        s = s + dis
    if scale_adapt:
        s = s * (d_k ** -0.5)
    else:
        s = s / math.sqrt(d_k)
    if mask is not None and mask.shape[-1] > 0:
        m = mask[..., :Tk] != 0
        if diag_mask:
            m = (~jnp.eye(Tq, Tk, dtype=bool)) & m
        m = m[:, None, :, :]
        s = jnp.where(m, s, -10000.0)
        a = _ref_norm(s, norm_method, train_len)
        return jnp.where(m, a, 0.0)
    return _ref_norm(s, norm_method, train_len)


if __name__ == "__main__":
    key = jax.random.PRNGKey(0)
    B, H, Tq, Tk, d_k = 2, 4, 16, 16, 32

    k1, _ = jax.random.split(key)
    scores = jax.random.normal(k1, (B, H, Tq, Tk), jnp.float32)

    # Length-based key mask (bool, as PyTorch passes): batch 0 keeps 12 keys, batch 1 all 16.
    lens = jnp.array([12, 16], jnp.int32)
    key_valid = jnp.arange(Tk)[None, :] < lens[:, None]                 # (B, Tk)
    mask = jnp.broadcast_to(key_valid[:, None, :], (B, Tq, Tk))         # bool

    cases = [
        dict(name="softmax+mask", mask=mask, norm_method="softmax"),
        dict(name="softmax no-mask", mask=None, norm_method="softmax"),
        dict(name="relu_plus+mask", mask=mask, norm_method="relu_plus"),
        dict(name="softmax_plus+diag", mask=mask, norm_method="softmax_plus", diag_mask=True),
        dict(name="g_sa softmax+mask", mask=mask, norm_method="softmax", g_sa=True),
        dict(name="scale_adapt softmax", mask=mask, norm_method="softmax", scale_adapt=True),
    ]

    for c in cases:
        kw = dict(d_k=d_k, att_type="mlh",
                  scale_adapt=c.get("scale_adapt", False),
                  norm_method=c["norm_method"],
                  diag_mask=c.get("diag_mask", False),
                  g_sa=c.get("g_sa", False),
                  train_len=512)
        out = attention_normalize(scores, c["mask"], **kw)
        out = jax.block_until_ready(out)
        ref = _reference(scores, c["mask"], **{k: v for k, v in kw.items() if k != "att_type"})
        assert out.shape == (B, H, Tq, Tk) and out.dtype == scores.dtype, c["name"]
        assert jnp.allclose(out, ref, atol=1e-4, rtol=1e-4), f"mismatch: {c['name']}"

    print("KERNEL_OK")
</pallas_src>

<mosaic_0001>
module attributes {stable_mosaic.version = 11 : i64} {
  func.func @_attn_norm_kernel(%arg0: i32, %arg1: i32, %arg2: memref<1x4x16x16xf32, #tpu.memory_space<vmem>>, %arg3: memref<1x16x16xi8, #tpu.memory_space<vmem>>, %arg4: memref<1x4x16x16xf32, #tpu.memory_space<vmem>>) attributes {dimension_semantics = [#tpu.dimension_semantics<parallel>, #tpu.dimension_semantics<parallel>], iteration_bounds = array<i64: 2, 1>, scalar_prefetch = 0 : i64, scratch_operands = 0 : i64, tpu.core_type = #tpu.core_type<tc>, window_params = [{transform_indices = @transform_0, window_bounds = array<i64: 1, 4, 16, 16>}, {transform_indices = @transform_1, window_bounds = array<i64: 1, 16, 16>}, {transform_indices = @transform_2, window_bounds = array<i64: 1, 4, 16, 16>}]} {
    %c0 = arith.constant 0 : index
    %c0_0 = arith.constant 0 : index
    %c0_1 = arith.constant 0 : index
    %c0_2 = arith.constant 0 : index
    %0 = vector.load %arg2[%c0, %c0_0, %c0_1, %c0_2] : memref<1x4x16x16xf32, #tpu.memory_space<vmem>>, vector<1x4x16x16xf32>
    %1 = vector.shape_cast %0 : vector<1x4x16x16xf32> to vector<4x16x16xf32>
    %cst = arith.constant 0.176776692 : f32
    %2 = vector.broadcast %cst : f32 to vector<4x16x16xf32>
    %3 = arith.mulf %1, %2 : vector<4x16x16xf32>
    %c0_3 = arith.constant 0 : index
    %c0_4 = arith.constant 0 : index
    %c0_5 = arith.constant 0 : index
    %4 = vector.load %arg3[%c0_3, %c0_4, %c0_5] : memref<1x16x16xi8, #tpu.memory_space<vmem>>, vector<1x16x16xi8>
    %5 = vector.shape_cast %4 : vector<1x16x16xi8> to vector<16x16xi8>
    %c0_i8 = arith.constant 0 : i8
    %6 = vector.broadcast %c0_i8 : i8 to vector<16x16xi8>
    %7 = arith.cmpi ne, %5, %6 : vector<16x16xi8>
    %cst_6 = arith.constant -1.000000e+04 : f32
    %8 = vector.shape_cast %7 : vector<16x16xi1> to vector<1x16x16xi1>
    %9 = vector.broadcast %8 : vector<1x16x16xi1> to vector<4x16x16xi1>
    %10 = vector.broadcast %cst_6 : f32 to vector<4x16x16xf32>
    %11 = arith.select %9, %3, %10 : vector<4x16x16xi1>, vector<4x16x16xf32>
    %cst_7 = arith.constant dense<0xFF800000> : vector<4x16xf32>
    %12 = vector.multi_reduction <maximumf>, %11, %cst_7 [2] : vector<4x16x16xf32> to vector<4x16xf32>
    %13 = vector.shape_cast %12 : vector<4x16xf32> to vector<4x16x1xf32>
    %14 = vector.broadcast %13 : vector<4x16x1xf32> to vector<4x16x16xf32>
    %15 = arith.subf %11, %14 : vector<4x16x16xf32>
    %16 = math.exp %15 : vector<4x16x16xf32>
    %cst_8 = arith.constant dense<0.000000e+00> : vector<4x16xf32>
    %17 = vector.multi_reduction <add>, %16, %cst_8 [2] : vector<4x16x16xf32> to vector<4x16xf32>
    %18 = vector.shape_cast %17 : vector<4x16xf32> to vector<4x16x1xf32>
    %19 = vector.broadcast %18 : vector<4x16x1xf32> to vector<4x16x16xf32>
    %20 = arith.divf %16, %19 : vector<4x16x16xf32>
    %cst_9 = arith.constant 0.000000e+00 : f32
    %21 = vector.shape_cast %7 : vector<16x16xi1> to vector<1x16x16xi1>
    %22 = vector.broadcast %21 : vector<1x16x16xi1> to vector<4x16x16xi1>
    %23 = vector.broadcast %cst_9 : f32 to vector<4x16x16xf32>
    %24 = arith.select %22, %20, %23 : vector<4x16x16xi1>, vector<4x16x16xf32>
    %c0_10 = arith.constant 0 : index
    %c0_11 = arith.constant 0 : index
    %c0_12 = arith.constant 0 : index
    %c0_13 = arith.constant 0 : index
    %25 = vector.load %arg4[%c0_10, %c0_11, %c0_12, %c0_13] : memref<1x4x16x16xf32, #tpu.memory_space<vmem>>, vector<1x4x16x16xf32>
    %26 = vector.shape_cast %25 : vector<1x4x16x16xf32> to vector<4x16x16xf32>
    %27 = vector.shape_cast %24 : vector<4x16x16xf32> to vector<1x4x16x16xf32>
    tpu.vector_store %arg4[%c0_10, %c0_11, %c0_12, %c0_13], %27 {strides = array<i32>} : memref<1x4x16x16xf32, #tpu.memory_space<vmem>>, vector<1x4x16x16xf32>,
    return
  }
  func.func @transform_0(%arg0: i32, %arg1: i32) -> (i32, i32, i32, i32) {
    %c0_i32 = arith.constant 0 : i32
    %c0_i32_0 = arith.constant 0 : i32
    %c0_i32_1 = arith.constant 0 : i32
    return %arg0, %c0_i32, %arg1, %c0_i32_0 : i32, i32, i32, i32
  }
  func.func @transform_1(%arg0: i32, %arg1: i32) -> (i32, i32, i32) {
    %c0_i32 = arith.constant 0 : i32
    %c0_i32_0 = arith.constant 0 : i32
    return %arg0, %arg1, %c0_i32 : i32, i32, i32
  }
  func.func @transform_2(%arg0: i32, %arg1: i32) -> (i32, i32, i32, i32) {
    %c0_i32 = arith.constant 0 : i32
    %c0_i32_0 = arith.constant 0 : i32
    %c0_i32_1 = arith.constant 0 : i32
    return %arg0, %c0_i32, %arg1, %c0_i32_0 : i32, i32, i32, i32
  }
}

</mosaic_0001>

<bundles_post_ra>
// kernel: tpu_custom_call.1
= control target key start
LH: loop header
LB: loop body
LE: loop exit
PB: predicated region body
PF: predicated region fallthrough
CT: control target
= control target key end

     0   :  { %7 = vsyncpa [#allocation3], 0  ;;  %s1061_s0 = inlined_call_operand.hbm [shape: f32[2,4,16,16], index: 0, kind: input, shape index: {}]   ;;  %s1062_s1 = inlined_call_operand.hbm [shape: s8[2,16,16], index: 1, kind: input, shape index: {}]   ;;  %s1063_s2 = inlined_call_operand.hbm [shape: f32[2,4,16,16], index: 2, kind: output, shape index: {}]  }
   0x1   :  { %9 = vsyncpa [#allocation3 + $0x1], 0 }
   0x2   :  { %10 = vsyncpa [#allocation6], 0 }
   0x3   :  { %12 = vsyncpa [#allocation6 + $0x1], 0 }
   0x4   :  { %13 = vsyncpa [#allocation4], 0 }
   0x5   :  { %15 = vsyncpa [#allocation4 + $0x1], 0  ;;  %s796_s9 = smov 0   ;;  %s798_s10 = smov 0  }
   0x6   :  { %s800_s11 = smov 0   ;;  %s802_s12 = smov 0  }
   0x7   :  { %s804_s13 = smov 0   ;;  %s806_s14 = smov 0  }
   0x8 LB: > { %s501_s15 = sadd.s32 4294967295, %s769_s14   ;;  %s502_s16 = sadd.s32 4294967294, %s769_s14   ;;  %s769_s14 = sphi %s806_s14, %s21_s14   ;;  %s765_s13 = sphi %s804_s13, %s1078_s13   ;;  %s761_s12 = sphi %s802_s12, %s1077_s12   ;;  %s757_s11 = sphi %s800_s11, %s1076_s11   ;;  %s753_s10 = sphi %s798_s10, %s1075_s10   ;;  %s749_s9 = sphi %s796_s9, %s1074_s9  }
   0x9   : > { %s33_s17 = sadd.s32 1, %s765_s13  ;;  %s42_s18 = sadd.s32 1, %s757_s11 }
   0xa   : > { %p35_p0 = scmp.ge.s32.totalorder %s33_s17, 2  ;;  %p49_p1 = scmp.ne.s32.totalorder %s757_s11, %s753_s10 }
   0xb   : > { %p50_p2 = scmp.eq.s32.totalorder %s769_s14, 0  ;;  %p55_p3 = scmp.ne.s32.totalorder %s753_s10, %s749_s9 }
   0xc   : > { %s1080_s17 = smov (%p35_p0, %s33_s17), 0  ;;  %p56_p5 = scmp.eq.s32.totalorder %s501_s15, 0 }
   0xd   : > { %p837_p4 = por %p50_p2, %p49_p1  ;;  %s37_s20 = ssub.s32 %s765_s13, %s1080_s17 }
   0xe   : > { %p109_p6 = scmp.eq.s32.totalorder %s501_s15, 1  ;;  %p40_p7 = scmp.eq.s32.totalorder %s37_s20, 0 }
   0xf   : > { %p843_p8 = por %p56_p5, %p55_p3  ;;  %p115_p10 = scmp.eq.s32.totalorder %s502_s16, 1 }
  0x10   : > { %p847_p9 = por %p109_p6, %p49_p1  ;;  %p504_p12 = scmp.ge.s32.totalorder %s769_s14, 2 }
  0x11   : > { %s852_s23 = scalar_select %p40_p7, %s757_s11, %s42_s18  }
  0x12   : > { %p854_p11 = por %p115_p10, %p55_p3  ;;  %p540_p13 = scmp.lt.s32.totalorder %s769_s14, 2 }
  0x13   : > { %s861_s25 = sand.u32 1, %s757_s11   ;;  %s520_s27 = sshll.u32 %s765_s13, 10 }
  0x14   : > { %s505_s26 = sshll.u32 %s861_s25, 6  ;;  %s147_s30 = scalar_lea.hbm %s1061_s0, %s520_s27 }
  0x15   : > { %s139_s3 = scalar_lea.vmem [#allocation2], %s505_s26  ;;  %p870_p0 = pnand %p540_p13, %p837_p4 }
  0x16   : > { %s148_s4 = sshll.u32 %s139_s3, 4  ;;  %p511_p1 = scmp.ge.s32.totalorder %s769_s14, 1  ;;  %s149_s4 = int_to_ptr.vmem [resolvable:$true] %s148_s4 }
  0x17   : > { %s136_s6 = scalar_lea.sflag [#allocation3], %s861_s25  ;;  %p631_p2 = pneg %p870_p0 }
  0x18   : > { %s642_s7 = scalar_lea.vmem %s149_s4, 1024  ;;  %s771_s8 = smov [#allocation2]  }
  0x19   : > { %p643_p3 = scmp.ne.s32.totalorder %s149_s4, %s642_s7  ;;  %s647_s15 = sshll.u32 %s771_s8, 4  ;;  %s648_s15 = int_to_ptr.vmem [resolvable:$false] %s647_s15 }
  0x1a   : > { %s649_s16 = scalar_lea.vmem %s648_s15, 2048  ;;  %p650_p4 = scmp.lt.s32.totalorder %s149_s4, %s648_s15 }
  0x1b   : > { %p645_p5 = pnand %p643_p3, %p631_p2  ;;  %p651_p7 = scmp.lt.s32.totalorder %s649_s16, %s642_s7 }
  0x1d   : > { %p646_p6 = pneg %p645_p5  ;;  %p652_p10 = por %p651_p7, %p650_p4 }
  0x1f   : > { %p653_p13 = pnand %p652_p10, %p646_p6 }
  0x21   : > { %656 = shalt.err (!%p653_p13)
}
  0x22   : > { %s772_s18 = smov 128   ;;  %s773_s19 = smov 8  }
  0x23   : > { %532 = dma.hbm_to_vmem [thread:$0]  (!%p870_p0), %s147_s30, 1024, %s149_s4, %s136_s6, %s772_s18, %s772_s18, %s773_s19  }
  0x24   : > { %p179_p3 = scmp.lt.s32.totalorder %s769_s14, 3  ;;  %s508_s20 = sshll.u32 %s861_s25, 2 }
  0x25   : > { %s521_s26 = sshll.u32 %s765_s13, 6  ;;  %s162_s7 = scalar_lea.vmem [#allocation5], %s508_s20 }
  0x26   : > { %p888_p5 = pnand %p511_p1, %p179_p3  ;;  %s170_s3 = scalar_lea.hbm %s1062_s1, %s521_s26 }
  0x27   : > { %s171_s8 = sshll.u32 %s162_s7, 4  ;;  %s159_s15 = scalar_lea.sflag [#allocation6], %s861_s25  ;;  %s172_s8 = int_to_ptr.vmem [resolvable:$true] %s171_s8 }
  0x28   : > { %s670_s16 = scalar_lea.vmem %s172_s8, 64  ;;  %s774_s30 = smov [#allocation5]  }
  0x29   : > { %p671_p6 = scmp.ne.s32.totalorder %s172_s8, %s670_s16  ;;  %s675_s4 = sshll.u32 %s774_s30, 4  ;;  %s676_s4 = int_to_ptr.vmem [resolvable:$false] %s675_s4 }
  0x2a   : > { %s677_s6 = scalar_lea.vmem %s676_s4, 128  ;;  %p678_p1 = scmp.lt.s32.totalorder %s172_s8, %s676_s4 }
  0x2b   : > { %p673_p4 = pnand %p671_p6, %p631_p2  ;;  %p679_p10 = scmp.lt.s32.totalorder %s677_s6, %s670_s16 }
  0x2d   : > { %p674_p7 = pneg %p673_p4  ;;  %p680_p13 = por %p679_p10, %p678_p1 }
  0x2f   : > { %p681_p3 = pnand %p680_p13, %p674_p7 }
  0x31   : > { %684 = shalt.err (!%p681_p3)
}
  0x32   : > { %s775_s18 = smov 32   ;;  %s776_s19 = smov 2  }
  0x33   : > { %535 = dma.hbm_to_vmem [thread:$0]  (!%p870_p0), %s170_s3, 64, %s172_s8, %s159_s15, %s775_s18, %s775_s18, %s776_s19  }
  0x34   : > { %183 = sbr.rel (%p888_p5) target bundleno = 412 (0x19c), region = 28  ;;  %s904_s25 = sand.u32 (!%p888_p5), 1, %s753_s10  }
  0x35   : > { %s512_s20 = sshll.u32 (!%p888_p5), %s904_s25, 6  ;;  %s186_s26 = scalar_lea.sflag (!%p888_p5), [#allocation3], %s904_s25 }
  0x36   : > { %s910_s28 = scalar_lea.vmem (!%p888_p5), [#allocation2], %s512_s20 }
  0x39   : > { %736 = dma.done.wait (%p843_p8), %s186_s26, 1024  }
  0x3a   : > { %738 = vsyncadd (%p843_p8), %s186_s26, 4294966272  ;;  %s513_s5 = sshll.u32 %s904_s25, 2  ;;  %s195_s27 = scalar_lea.sflag [#allocation6], %s904_s25 }
  0x3b   : > { %s198_s29 = scalar_lea.vmem [#allocation5], %s513_s5 }
  0x3c   : > { %740 = dma.done.wait (%p843_p8), %s195_s27, 64  }
  0x3d   : > { %742 = vsyncadd (%p843_p8), %s195_s27, 4294967232  ;;  %v229_v0 = vld [vmem:[%s910_s28] sm:$0xff]  ;;  %v231_v2 = vld [vmem:[%s910_s28 + $0x10] sm:$0xff]  ;;  %v777_v6 = vmov 0   ;;  %vm267_vm1 = vcmask 130048   ;;  %s974_s21 = scalar_lea.vmem [#allocation7], %s512_s20 }
  0x3e   : > { %v245_v1 = vld [vmem:[%s198_s29] sm:$0x3]  ;;  %v237_v3 = vmul.f32 0.17677669, %v229_v0  ;;  %v230_v4 = vld [vmem:[%s910_s28 + $0x8] sm:$0xff]  ;;  %v232_v5 = vld [vmem:[%s910_s28 + $0x18] sm:$0xff] }
  0x3f   : > { %vm247_vm0 = vnez %v245_v1  ;;  %v239_v8 = vmul.f32 0.17677669, %v231_v2  ;;  %v246_v9 = vld [vmem:[%s198_s29 + $0x2] sm:$0x3]  ;;  %v234_v12 = vld [vmem:[%s910_s28 + $0x28] sm:$0xff]  ;;  %v235_v25 = vld [vmem:[%s910_s28 + $0x30] sm:$0xff] }
  0x40   : > { %v249_v7 = vsel %vm247_vm0, 16843009, %v777_v6  ;;  %vm248_vm2 = vnez %v246_v9  ;;  %v233_v11 = vld [vmem:[%s910_s28 + $0x20] sm:$0xff]  ;;  %v238_v13 = vmul.f32 0.17677669, %v230_v4  ;;  %v236_v26 = vld [vmem:[%s910_s28 + $0x38] sm:$0xff] }
  0x41   : > { %v251_v10 = vunpack.c.0.s8 %v249_v7  ;;  %v250_v14 = vsel %vm248_vm2, 16843009, %v777_v6  ;;  %v240_v15 = vmul.f32 0.17677669, %v232_v5  ;;  %v241_v20 = vmul.f32 0.17677669, %v233_v11 }
  0x42   : > { %v252_v17 = vunpack.c.0.s8 %v250_v14  ;;  %v242_v21 = vmul.f32 0.17677669, %v234_v12  ;;  %v243_v33 = vmul.f32 0.17677669, %v235_v25  ;;  %v244_v34 = vmul.f32 0.17677669, %v236_v26 }
  0x43   : > { %vm928_vm3 = vcmp.ne.s32.totalorder %v251_v10, 0  ;;  %s522_s3 = sshll.u32 %s761_s12, 10  ;;  %s388_s7 = sshll.u32 %s974_s21, 4  ;;  %s1009_s7 = int_to_ptr.vmem [resolvable:$true] %s388_s7 }
  0x44   : > { %v259_v18 = vsel %vm928_vm3, %v237_v3, -10000.0  ;;  %v261_v19 = vsel %vm928_vm3, %v239_v8, -10000.0  ;;  %vm938_vm4 = vcmp.ne.s32.totalorder %v252_v17, 0  ;;  %v263_v31 = vsel %vm928_vm3, %v241_v20, -10000.0  ;;  %s1007_s16 = scalar_lea.hbm %s1063_s2, %s522_s3  ;;  %s373_s12 = scalar_lea.sflag [#allocation4], %s904_s25 }
  0x45   : > { %v268_v22 = vsel %vm267_vm1, %v259_v18, -inf  ;;  %v274_v23 = vsel %vm267_vm1, %v261_v19, -inf  ;;  %v260_v27 = vsel %vm938_vm4, %v238_v13, -10000.0  ;;  %v262_v28 = vsel %vm938_vm4, %v240_v15, -10000.0  ;;  %s685_s30 = scalar_lea.vmem %s1009_s7, 1024  ;;  %s778_s4 = smov [#allocation7]  }
  0x46   : > { %269 = vmax.xlane.f32.xlu0 %v268_v22  ;;  %275 = vmax.xlane.f32.xlu1 %v274_v23  ;;  %v271_v29 = vsel %vm267_vm1, %v260_v27, -inf  ;;  %v277_v30 = vsel %vm267_vm1, %v262_v28, -inf  ;;  %v264_v32 = vsel %vm938_vm4, %v242_v21, -10000.0  ;;  %v280_v35 = vsel %vm267_vm1, %v263_v31, -inf  ;;  %p686_p8 = scmp.ne.s32.totalorder %s1009_s7, %s685_s30  ;;  %s689_s6 = sshll.u32 %s778_s4, 4  ;;  %s690_s6 = int_to_ptr.vmem [resolvable:$false] %s689_s6 }
  0x47   : > { %v283_v36 = vsel %vm267_vm1, %v264_v32, -inf  ;;  %v265_v37 = vsel %vm928_vm3, %v243_v33, -10000.0  ;;  %v266_v38 = vsel %vm938_vm4, %v244_v34, -10000.0  ;;  %s691_s18 = scalar_lea.vmem %s690_s6, 2048  ;;  %p692_p5 = scmp.lt.s32.totalorder %s1009_s7, %s690_s6 }
  0x48   : > { %v286_v39 = vsel %vm267_vm1, %v265_v37, -inf  ;;  %v289_v40 = vsel %vm267_vm1, %v266_v38, -inf  ;;  %p687_p0 = pnand %p686_p8, %p847_p9  ;;  %p693_p6 = scmp.lt.s32.totalorder %s691_s18, %s685_s30 }
  0x4a   : > { %272 = vmax.xlane.f32.xlu0 %v271_v29  ;;  %278 = vmax.xlane.f32.xlu1 %v277_v30  ;;  %p688_p2 = pneg %p687_p0  ;;  %p694_p4 = por %p693_p6, %p692_p5 }
  0x4c   : > { %p695_p7 = pnand %p694_p4, %p688_p2 }
  0x4e   : > { %281 = vmax.xlane.f32.xlu0 %v280_v35  ;;  %284 = vmax.xlane.f32.xlu1 %v283_v36 }
  0x52   : > { %287 = vmax.xlane.f32.xlu0 %v286_v39  ;;  %290 = vmax.xlane.f32.xlu1 %v289_v40 }
  0xcf   : > { %v270_v41 = vpop.xlane.xlu0 %269  ;;  %v276_v42 = vpop.xlane.xlu1 %275 }
  0xd0   : > { %v292_v43 = vsub.f32 %v259_v18, %v270_v41  ;;  %v294_v44 = vsub.f32 %v261_v19, %v276_v42 }
  0xd2   : > { %v300_v45 = vmul.f32 1.442695, %v292_v43  ;;  %v304_v46 = vmul.f32 1.442695, %v294_v44 }
  0xd3   : > { %v273_v47 = vpop.xlane.xlu0 %272  ;;  %v279_v48 = vpop.xlane.xlu1 %278 }
  0xd4   : > { %597 = vpow2.f32 %v300_v45  ;;  %v293_v49 = vsub.f32 %v260_v27, %v273_v47  ;;  %v295_v50 = vsub.f32 %v262_v28, %v279_v48 }
  0xd5   : > { %599 = vpow2.f32 %v304_v46 }
  0xd6   : > { %v302_v51 = vmul.f32 1.442695, %v293_v49  ;;  %v306_v52 = vmul.f32 1.442695, %v295_v50 }
  0xd7   : > { %v282_v53 = vpop.xlane.xlu0 %281  ;;  %v285_v54 = vpop.xlane.xlu1 %284 }
  0xd8   : > { %601 = vpow2.f32 %v302_v51  ;;  %v296_v55 = vsub.f32 %v263_v31, %v282_v53  ;;  %v297_v56 = vsub.f32 %v264_v32, %v285_v54 }
  0xd9   : > { %603 = vpow2.f32 %v306_v52 }
  0xda   : > { %v308_v57 = vmul.f32 1.442695, %v296_v55  ;;  %v310_v58 = vmul.f32 1.442695, %v297_v56 }
  0xdb   : > { %v288_v59 = vpop.xlane.xlu0 %287  ;;  %v291_v60 = vpop.xlane.xlu1 %290 }
  0xdc   : > { %605 = vpow2.f32 %v308_v57  ;;  %v298_v61 = vsub.f32 %v265_v37, %v288_v59  ;;  %v299_v62 = vsub.f32 %v266_v38, %v291_v60 }
  0xdd   : > { %607 = vpow2.f32 %v310_v58 }
  0xde   : > { %v312_v63 = vmul.f32 1.442695, %v298_v61  ;;  %v314_v0 = vmul.f32 1.442695, %v299_v62 }
  0xe0   : > { %609 = vpow2.f32 %v312_v63 }
  0xe1   : > { %v598_v1 = vpop.eup %597  ;;  %611 = vpow2.f32 %v314_v0 }
  0xe2   : > { %v600_v2 = vpop.eup %599  ;;  %v316_v3 = vsel %vm267_vm1, %v598_v1, 0.0 }
  0xe3   : > { %317 = vadd.xlane.f32.xlu0 %v316_v3  ;;  %v322_v4 = vsel %vm267_vm1, %v600_v2, 0.0 }
  0xe5   : > { %v602_v5 = vpop.eup %601 }
  0xe6   : > { %v604_v6 = vpop.eup %603  ;;  %v319_v7 = vsel %vm267_vm1, %v602_v5, 0.0 }
  0xe7   : > { %323 = vadd.xlane.f32.xlu0 %v322_v4  ;;  %320 = vadd.xlane.f32.xlu1 %v319_v7  ;;  %v325_v8 = vsel %vm267_vm1, %v604_v6, 0.0 }
  0xe9   : > { %v606_v9 = vpop.eup %605 }
  0xea   : > { %v608_v10 = vpop.eup %607  ;;  %v328_v11 = vsel %vm267_vm1, %v606_v9, 0.0 }
  0xeb   : > { %326 = vadd.xlane.f32.xlu1 %v325_v8  ;;  %329 = vadd.xlane.f32.xlu0 %v328_v11  ;;  %v331_v12 = vsel %vm267_vm1, %v608_v10, 0.0 }
  0xed   : > { %v610_v13 = vpop.eup %609 }
  0xee   : > { %v612_v14 = vpop.eup %611  ;;  %v334_v15 = vsel %vm267_vm1, %v610_v13, 0.0 }
  0xef   : > { %332 = vadd.xlane.f32.xlu1 %v331_v12  ;;  %335 = vadd.xlane.f32.xlu0 %v334_v15  ;;  %v337_v17 = vsel %vm267_vm1, %v612_v14, 0.0 }
  0xf3   : > { %338 = vadd.xlane.f32.xlu1 %v337_v17 }
 0x16c   : > { %v318_v18 = vpop.xlane.xlu0 %317 }
 0x16d   : > { %613 = vrcp.f32 %v318_v18 }
 0x170   : > { %v321_v19 = vpop.xlane.xlu1 %320  ;;  %v324_v20 = vpop.xlane.xlu0 %323 }
 0x171   : > { %615 = vrcp.f32 %v321_v19 }
 0x172   : > { %617 = vrcp.f32 %v324_v20 }
 0x174   : > { %v327_v21 = vpop.xlane.xlu1 %326  ;;  %v330_v22 = vpop.xlane.xlu0 %329 }
 0x175   : > { %619 = vrcp.f32 %v327_v21 }
 0x176   : > { %621 = vrcp.f32 %v330_v22 }
 0x178   : > { %v333_v23 = vpop.xlane.xlu1 %332  ;;  %v336_v25 = vpop.xlane.xlu0 %335 }
 0x179   : > { %623 = vrcp.f32 %v333_v23 }
 0x17a   : > { %v614_v26 = vpop.eup %613  ;;  %625 = vrcp.f32 %v336_v25 }
 0x17b   : > { %v341_v27 = vmul.f32 %v614_v26, %v598_v1 }
 0x17c   : > { %v339_v28 = vpop.xlane.xlu1 %338 }
 0x17d   : > { %v356_v29 = vsel %vm928_vm3, %v341_v27, 0.0  ;;  %627 = vrcp.f32 %v339_v28 }
 0x17e   : > { %v616_v30 = vpop.eup %615  ;;  %364 = vst.msk [vmem:[%s974_s21] sm:$0xff] %vm267_vm1, %v356_v29 }
 0x17f   : > { %v618_v31 = vpop.eup %617  ;;  %v343_v32 = vmul.f32 %v616_v30, %v602_v5 }
 0x180   : > { %v345_v33 = vmul.f32 %v618_v31, %v600_v2 }
 0x181   : > { %v357_v34 = vsel %vm938_vm4, %v343_v32, 0.0 }
 0x182   : > { %v620_v35 = vpop.eup %619  ;;  %365 = vst.msk [vmem:[%s974_s21 + $0x8] sm:$0xff] %vm267_vm1, %v357_v34  ;;  %v358_v36 = vsel %vm928_vm3, %v345_v33, 0.0 }
 0x183   : > { %v622_v37 = vpop.eup %621  ;;  %366 = vst.msk [vmem:[%s974_s21 + $0x10] sm:$0xff] %vm267_vm1, %v358_v36  ;;  %v347_v38 = vmul.f32 %v620_v35, %v604_v6 }
 0x184   : > { %v349_v39 = vmul.f32 %v622_v37, %v606_v9 }
 0x185   : > { %v359_v40 = vsel %vm938_vm4, %v347_v38, 0.0 }
 0x186   : > { %v624_v41 = vpop.eup %623  ;;  %367 = vst.msk [vmem:[%s974_s21 + $0x18] sm:$0xff] %vm267_vm1, %v359_v40  ;;  %v360_v42 = vsel %vm928_vm3, %v349_v39, 0.0 }
 0x187   : > { %v626_v43 = vpop.eup %625  ;;  %368 = vst.msk [vmem:[%s974_s21 + $0x20] sm:$0xff] %vm267_vm1, %v360_v42  ;;  %v351_v44 = vmul.f32 %v624_v41, %v608_v10 }
 0x188   : > { %v353_v45 = vmul.f32 %v626_v43, %v610_v13 }
 0x189   : > { %v361_v46 = vsel %vm938_vm4, %v351_v44, 0.0 }
 0x18a   : > { %v628_v47 = vpop.eup %627  ;;  %369 = vst.msk [vmem:[%s974_s21 + $0x28] sm:$0xff] %vm267_vm1, %v361_v46  ;;  %v362_v48 = vsel %vm928_vm3, %v353_v45, 0.0 }
 0x18b   : > { %370 = vst.msk [vmem:[%s974_s21 + $0x30] sm:$0xff] %vm267_vm1, %v362_v48  ;;  %v355_v49 = vmul.f32 %v628_v47, %v612_v14 }
 0x18d   : > { %v363_v50 = vsel %vm938_vm4, %v355_v49, 0.0 }
 0x18e   : > { %371 = vst.msk [vmem:[%s974_s21 + $0x38] sm:$0xff] %vm267_vm1, %v363_v50 }
 0x18f   : > { %698 = shalt.err (!%p695_p7)
}
 0x190   : > { %s699_s19 = scalar_lea.hbm %s1007_s16, 1024  ;;  %s703_s28 = scalar_lea.hbm %s1063_s2, 2048 }
 0x191   : > { %p700_p1 = scmp.ne.s32.totalorder %s1007_s16, %s699_s19  ;;  %p704_p3 = scmp.lt.s32.totalorder %s1007_s16, %s1063_s2 }
 0x192   : > { %p705_p8 = scmp.lt.s32.totalorder %s703_s28, %s699_s19 }
 0x193   : > { %p701_p10 = pnand %p700_p1, %p847_p9 }
 0x194   : > { %p706_p0 = por %p705_p8, %p704_p3 }
 0x195   : > { %p702_p13 = pneg %p701_p10 }
 0x197   : > { %p707_p2 = pnand %p706_p0, %p702_p13 }
 0x199   : > { %710 = shalt.err (!%p707_p2)
}
 0x19a   : > { %s779_s29 = smov 128   ;;  %s780_s21 = smov 8  }
 0x19b   : > { %527 = dma.vmem_to_hbm [thread:$0]  (%p847_p9), %s1009_s7, 1024, %s1007_s16, %s373_s12, %s779_s29, %s779_s29, %s780_s21  }
 0x19c PF: > { %s403_s3 = sand.u32 1, %s749_s9   ;;  %p537_p5 = pnand %p504_p12, %p854_p11 }
 0x19d   : > { %s404_s8 = scalar_lea.sflag [#allocation4], %s403_s3 }
 0x19e   : > { %p538_p6 = pneg %p537_p5 }
 0x1a0   : > { %744 = dma.done.wait (%p538_p6), %s404_s8, 1024  }
 0x1a1   : > { %746 = vsyncadd (%p538_p6), %s404_s8, 4294966272  ;;  %s21_s14 = sadd.s32 1, %s769_s14   ;;  %s1074_s9 = smov %s753_s10 }
 0x1a2   : > { %p18_p4 = scmp.ge.s32.totalorder %s21_s14, 4   ;;  %s1075_s10 = smov %s757_s11 }
 0x1a3   : > { %s1076_s11 = smov %s852_s23  ;;  %s1077_s12 = smov %s765_s13 }
 0x1a4   : > { %s1078_s13 = smov %s1080_s17  ;;  %20 = sbr.rel (!%p18_p4) target bundleno = 8 (0x8), region = 86 }
 0x1a9   :  { %409 = vsyncpa [#allocation3], 1 }
 0x1aa   :  { %411 = vsyncpa [#allocation3 + $0x1], 1 }
 0x1ab   :  { %412 = vsyncpa [#allocation6], 1 }
 0x1ac   :  { %414 = vsyncpa [#allocation6 + $0x1], 1 }
 0x1ad   :  { %415 = vsyncpa [#allocation4], 1 }
 0x1ae   :  { %417 = vsyncpa [#allocation4 + $0x1], 1 }

</bundles_post_ra>
